<compile_context>
chip_gen: v7x
topology: tpu7x:2x2x1
jax: 0.10.0
libtpu: 0.0.40
codegen_flags: <defaults>
</compile_context>

<pallas_src>
import functools

import jax
import jax.numpy as jnp
from jax import lax
from jax.experimental import pallas as pl
from jax.experimental.pallas import tpu as pltpu


def query_attn_kernel(dq_ref,        # (B, S, D) dynamic question embedding tile
                      we_ref,        # (B, S, D) word embedding tile
                      qlen_ref,      # (B, 1) int32 question lengths
                      w1_ref,        # (D, D) feat_enhance weight (activation dtype)
                      b1_ref,        # (1, D) f32
                      w2_ref,        # (1, D) f32 fc weight as a row
                      b2_ref,        # (1, 1) f32
                      out_emb_ref,   # (B, D) pooled word embedding
                      attn_ref,      # (B, S_attn) lane-dense attention weights
                      *,
                      pool_dtype):   # dtype used for the pooled multiply
    B, S, D = dq_ref.shape
    S_attn = attn_ref.shape[1]

    # ---- feat_enhance: one (B*S, D) @ (D, D) MXU matmul, f32 accumulation ----
    # S is padded to a multiple of 8 by the wrapper, so this reshape is a view.
    x = dq_ref[...].reshape(B * S, D)                      # native dtype (bf16 ok)
    h = jnp.dot(x, w1_ref[...], preferred_element_type=jnp.float32)
    h = h + b1_ref[...]                                    # (B*S, D) f32

    # ---- fused F.normalize(p=2) + fc --------------------------------------
    #   (h / max(||h||, 1e-12)) @ w2 + b2
    #     == (sum_d h*w2_row) * rsqrt(max(||h||^2, 1e-24)) + b2
    # Both row reductions come out of one VPU/XLU pass over h; no 1-column
    # MXU matmul.
    w2_row = w2_ref[...]                                   # (1, D) f32
    ss = jnp.sum(h * h, axis=-1, keepdims=True)            # (B*S, 1)
    raw = jnp.sum(h * w2_row, axis=-1, keepdims=True)      # (B*S, 1)
    inv_norm = lax.rsqrt(jnp.maximum(ss, 1e-24))           # EUP
    logits = (raw * inv_norm + b2_ref[...]).reshape(B, S)  # lane-dense (B, S)

    # ---- softmax + length mask + renorm, fused into one exact divide --------
    #   softmax -> *mask -> /(sum+1e-5)  ==  e*mask / (sum(e*mask) + 1e-5*sum(e))
    m = jnp.max(logits, axis=-1, keepdims=True)            # (B, 1)
    e = jnp.exp(logits - m)
    pos = lax.broadcasted_iota(jnp.int32, (B, S), 1)
    mask = (pos < qlen_ref[...]).astype(jnp.float32)       # (B, 1) broadcast
    em = e * mask
    denom = (jnp.sum(em, axis=-1, keepdims=True)
             + 1e-5 * jnp.sum(e, axis=-1, keepdims=True))
    attn = em * pl.reciprocal(denom, approx=False)         # (B, S) f32

    # ---- pooled word embedding: out[b] = sum_s attn[b, s] * we[b, s, :] -----
    # Multiply in the word-embedding dtype (bf16 on v6e/v7x), accumulate f32.
    prod = attn.astype(pool_dtype)[:, :, None] * we_ref[...].astype(pool_dtype)
    out = jnp.sum(prod, axis=1, dtype=jnp.float32)         # (B, D) f32
    out_emb_ref[...] = out.astype(out_emb_ref.dtype)

    # ---- lane-dense attention store (padded to a 128 multiple) --------------
    if S_attn != S:
        attn = jnp.concatenate(
            [attn, jnp.zeros((B, S_attn - S), jnp.float32)], axis=1)
    attn_ref[...] = attn.astype(attn_ref.dtype)


def _round_up(x, m):
    return ((x + m - 1) // m) * m


def _pick_batch_block(bs, S, target_rows=1024):
    """Batch elements per grid step.

    Aim for ~target_rows rows in the per-step (b_blk*S, D) matmul (amortizes
    per-step overhead, fills the MXU, ~85% of HBM roofline class tiles) while
    keeping b_blk a multiple of 8 (sublane tiling of the 2-D outputs) whenever
    it does not cover the whole batch, and keeping n_blocks >= 2 when the
    batch is large enough so the "parallel" axis can feed both v7x TCs.
    """
    if bs <= 8 or bs * S <= target_rows:
        return bs                                   # single block covers all
    b_blk = max(8, ((target_rows // max(S, 1)) // 8) * 8)
    half = max(8, ((bs // 2) // 8) * 8)             # leave at least two blocks
    return min(b_blk, half, bs)


def query_attn(word_embedding, dyn_q_emb, question_len, w1, b1, w2, b2,
               b_blk=None):
    bs, S, D = dyn_q_emb.shape
    S_orig = S

    # Pad the sequence dim once (only if needed) so the in-kernel (B*S, D)
    # reshape stays a zero-cost view under the (8, 128) sublane tiling.  The
    # padded positions fall outside question_len, so the in-kernel mask zeroes
    # them; attn is sliced back below.
    S_k = _round_up(S, 8)
    if S_k != S:
        pad = S_k - S
        word_embedding = jnp.pad(word_embedding, ((0, 0), (0, pad), (0, 0)))
        dyn_q_emb = jnp.pad(dyn_q_emb, ((0, 0), (0, pad), (0, 0)))

    if b_blk is None:
        b_blk = _pick_batch_block(bs, S_k)
    n_blocks = pl.cdiv(bs, b_blk)   # partial last block handled by Pallas
                                    # (row-local garbage reads, dropped writes)

    # Lane-dense attention output width (multiple of 128 -> unmasked stores).
    S_attn = S_k if S_k % 128 == 0 else _round_up(S_k, 128)

    qlen_2d = question_len.astype(jnp.int32).reshape(bs, 1)
    w1_c = w1.astype(dyn_q_emb.dtype)            # bf16 MXU matmul when acts are bf16
    b1_2d = b1.astype(jnp.float32).reshape(1, D)
    w2_row = w2.astype(jnp.float32).reshape(1, D)   # (D, 1) -> (1, D) row
    b2_2d = b2.astype(jnp.float32).reshape(1, 1)

    pool_dtype = (word_embedding.dtype
                  if word_embedding.dtype == jnp.bfloat16 else jnp.float32)
    kernel = functools.partial(query_attn_kernel, pool_dtype=pool_dtype)

    grid_spec = pltpu.PrefetchScalarGridSpec(
        num_scalar_prefetch=0,
        grid=(n_blocks,),
        in_specs=[
            pl.BlockSpec((b_blk, S_k, D), lambda b: (b, 0, 0)),  # dyn_q_emb
            pl.BlockSpec((b_blk, S_k, D), lambda b: (b, 0, 0)),  # word_embedding
            pl.BlockSpec((b_blk, 1),      lambda b: (b, 0)),     # question_len
            pl.BlockSpec((D, D),          lambda b: (0, 0)),     # w1 (resident)
            pl.BlockSpec((1, D),          lambda b: (0, 0)),     # b1
            pl.BlockSpec((1, D),          lambda b: (0, 0)),     # w2 row
            pl.BlockSpec((1, 1),          lambda b: (0, 0)),     # b2
        ],
        out_specs=[
            pl.BlockSpec((b_blk, D),      lambda b: (b, 0)),     # pooled embedding
            pl.BlockSpec((b_blk, S_attn), lambda b: (b, 0)),     # attention weights
        ],
    )

    out_emb, attn = pl.pallas_call(
        kernel,
        out_shape=(
            jax.ShapeDtypeStruct((bs, D), word_embedding.dtype),
            jax.ShapeDtypeStruct((bs, S_attn), jnp.float32),
        ),
        grid_spec=grid_spec,
        compiler_params=pltpu.CompilerParams(
            dimension_semantics=("parallel",)),   # batch blocks are independent
    )(dyn_q_emb, word_embedding, qlen_2d, w1_c, b1_2d, w2_row, b2_2d)

    if S_attn != S_orig:
        attn = attn[:, :S_orig]
    return out_emb, attn


def query_attn_reference(word_embedding, dyn_q_emb, question_len, w1, b1, w2, b2):
    bs, S, D = dyn_q_emb.shape
    h = dyn_q_emb @ w1 + b1
    h = h / jnp.maximum(jnp.linalg.norm(h, axis=-1, keepdims=True), 1e-12)
    logits = (h @ w2).squeeze(-1) + b2                      # (bs, S)
    attn = jax.nn.softmax(logits, axis=1)
    mask = (jnp.arange(S)[None, :] < question_len[:, None]).astype(jnp.float32)
    attn = attn * mask
    attn = attn / (attn.sum(1, keepdims=True) + 1e-5)
    out = jnp.einsum('bs,bsd->bd', attn, word_embedding)
    return out, attn


if __name__ == "__main__":
    bs, S, D = 2, 8, 32     # small shapes; module default module_dim=768 also works

    key = jax.random.PRNGKey(0)
    k_we, k_dq, k_w1, k_b1, k_w2, k_b2 = jax.random.split(key, 6)

    word_embedding = jax.random.normal(k_we, (bs, S, D), jnp.float32)
    dyn_q_emb = jax.random.normal(k_dq, (bs, S, D), jnp.float32)
    question_len = jnp.array([5, 8], dtype=jnp.int32)

    # deterministic "Linear" parameters (x @ W + b convention)
    w1 = jax.random.normal(k_w1, (D, D), jnp.float32) * (1.0 / jnp.sqrt(D))
    b1 = jax.random.normal(k_b1, (D,), jnp.float32) * 0.01
    w2 = jax.random.normal(k_w2, (D, 1), jnp.float32) * (1.0 / jnp.sqrt(D))
    b2 = jax.random.normal(k_b2, (1,), jnp.float32) * 0.01

    out_emb, attn = query_attn(word_embedding, dyn_q_emb, question_len,
                               w1, b1, w2, b2)
    jax.block_until_ready((out_emb, attn))

    ref_emb, ref_attn = query_attn_reference(word_embedding, dyn_q_emb,
                                             question_len, w1, b1, w2, b2)
    assert attn.shape == ref_attn.shape and out_emb.shape == ref_emb.shape
    assert jnp.allclose(attn, ref_attn, atol=1e-5, rtol=1e-5), "attn mismatch"
    assert jnp.allclose(out_emb, ref_emb, atol=1e-5, rtol=1e-5), "embedding mismatch"

    print("KERNEL_OK")
</pallas_src>

<mosaic_0001>
module attributes {stable_mosaic.version = 11 : i64} {
  func.func @query_attn_kernel(%arg0: i32, %arg1: memref<2x8x32xf32, #tpu.memory_space<vmem>>, %arg2: memref<2x8x32xf32, #tpu.memory_space<vmem>>, %arg3: memref<2x1xi32, #tpu.memory_space<vmem>>, %arg4: memref<32x32xf32, #tpu.memory_space<vmem>>, %arg5: memref<1x32xf32, #tpu.memory_space<vmem>>, %arg6: memref<1x32xf32, #tpu.memory_space<vmem>>, %arg7: memref<1x1xf32, #tpu.memory_space<vmem>>, %arg8: memref<2x32xf32, #tpu.memory_space<vmem>>, %arg9: memref<2x128xf32, #tpu.memory_space<vmem>>) attributes {dimension_semantics = [#tpu.dimension_semantics<parallel>], iteration_bounds = array<i64: 1>, scalar_prefetch = 0 : i64, scratch_operands = 0 : i64, tpu.core_type = #tpu.core_type<tc>, window_params = [{transform_indices = @transform_0, window_bounds = array<i64: 2, 8, 32>}, {transform_indices = @transform_1, window_bounds = array<i64: 2, 8, 32>}, {transform_indices = @transform_2, window_bounds = array<i64: 2, 1>}, {pipeline_mode = #tpu.pipeline_mode<synchronous>, transform_indices = @transform_3, window_bounds = array<i64: 32, 32>}, {pipeline_mode = #tpu.pipeline_mode<synchronous>, transform_indices = @transform_4, window_bounds = array<i64: 1, 32>}, {pipeline_mode = #tpu.pipeline_mode<synchronous>, transform_indices = @transform_5, window_bounds = array<i64: 1, 32>}, {pipeline_mode = #tpu.pipeline_mode<synchronous>, transform_indices = @transform_6, window_bounds = array<i64: 1, 1>}, {transform_indices = @transform_7, window_bounds = array<i64: 2, 32>}, {transform_indices = @transform_8, window_bounds = array<i64: 2, 128>}]} {
    %c0 = arith.constant 0 : index
    %c0_0 = arith.constant 0 : index
    %c0_1 = arith.constant 0 : index
    %0 = vector.load %arg1[%c0, %c0_0, %c0_1] : memref<2x8x32xf32, #tpu.memory_space<vmem>>, vector<2x8x32xf32>
    %1 = vector.shape_cast %0 : vector<2x8x32xf32> to vector<16x32xf32>
    %c0_2 = arith.constant 0 : index
    %c0_3 = arith.constant 0 : index
    %2 = vector.load %arg4[%c0_2, %c0_3] : memref<32x32xf32, #tpu.memory_space<vmem>>, vector<32x32xf32>
    %cst = arith.constant dense<0.000000e+00> : vector<16x32xf32>
    %3 = tpu.matmul %1, %2, %cst {dimension_numbers = #tpu.dot_dimension_numbers<[1], [0], [0], [1], [0, 0, 1, 1], [], []>} : vector<16x32xf32>, vector<32x32xf32>, vector<16x32xf32> -> vector<16x32xf32>
    %c0_4 = arith.constant 0 : index
    %c0_5 = arith.constant 0 : index
    %4 = vector.load %arg5[%c0_4, %c0_5] : memref<1x32xf32, #tpu.memory_space<vmem>>, vector<1x32xf32>
    %5 = vector.broadcast %4 : vector<1x32xf32> to vector<16x32xf32>
    %6 = arith.addf %3, %5 : vector<16x32xf32>
    %c0_6 = arith.constant 0 : index
    %c0_7 = arith.constant 0 : index
    %7 = vector.load %arg6[%c0_6, %c0_7] : memref<1x32xf32, #tpu.memory_space<vmem>>, vector<1x32xf32>
    %8 = arith.mulf %6, %6 : vector<16x32xf32>
    %cst_8 = arith.constant dense<0.000000e+00> : vector<16xf32>
    %9 = vector.multi_reduction <add>, %8, %cst_8 [1] : vector<16x32xf32> to vector<16xf32>
    %10 = vector.shape_cast %9 : vector<16xf32> to vector<16x1xf32>
    %11 = vector.broadcast %7 : vector<1x32xf32> to vector<16x32xf32>
    %12 = arith.mulf %6, %11 : vector<16x32xf32>
    %cst_9 = arith.constant dense<0.000000e+00> : vector<16xf32>
    %13 = vector.multi_reduction <add>, %12, %cst_9 [1] : vector<16x32xf32> to vector<16xf32>
    %14 = vector.shape_cast %13 : vector<16xf32> to vector<16x1xf32>
    %cst_10 = arith.constant 1.000000e-24 : f32
    %15 = vector.broadcast %cst_10 : f32 to vector<16x1xf32>
    %16 = arith.maximumf %10, %15 : vector<16x1xf32>
    %17 = math.rsqrt %16 : vector<16x1xf32>
    %18 = arith.mulf %14, %17 : vector<16x1xf32>
    %c0_11 = arith.constant 0 : index
    %c0_12 = arith.constant 0 : index
    %19 = vector.load %arg7[%c0_11, %c0_12] : memref<1x1xf32, #tpu.memory_space<vmem>>, vector<1x1xf32>
    %20 = vector.broadcast %19 : vector<1x1xf32> to vector<16x1xf32>
    %21 = arith.addf %18, %20 : vector<16x1xf32>
    %22 = vector.shape_cast %21 : vector<16x1xf32> to vector<2x8xf32>
    %cst_13 = arith.constant dense<0xFF800000> : vector<2xf32>
    %23 = vector.multi_reduction <maximumf>, %22, %cst_13 [1] : vector<2x8xf32> to vector<2xf32>
    %24 = vector.shape_cast %23 : vector<2xf32> to vector<2x1xf32>
    %25 = vector.broadcast %24 : vector<2x1xf32> to vector<2x8xf32>
    %26 = arith.subf %22, %25 : vector<2x8xf32>
    %27 = math.exp %26 : vector<2x8xf32>
    %28 = tpu.iota {dimensions = array<i32: 1>} : vector<2x8xi32>
    %c0_14 = arith.constant 0 : index
    %c0_15 = arith.constant 0 : index
    %29 = vector.load %arg3[%c0_14, %c0_15] : memref<2x1xi32, #tpu.memory_space<vmem>>, vector<2x1xi32>
    %30 = vector.broadcast %29 : vector<2x1xi32> to vector<2x8xi32>
    %31 = arith.cmpi slt, %28, %30 : vector<2x8xi32>
    %32 = arith.extui %31 : vector<2x8xi1> to vector<2x8xi32>
    %33 = arith.sitofp %32 : vector<2x8xi32> to vector<2x8xf32>
    %34 = arith.mulf %27, %33 : vector<2x8xf32>
    %cst_16 = arith.constant dense<0.000000e+00> : vector<2xf32>
    %35 = vector.multi_reduction <add>, %34, %cst_16 [1] : vector<2x8xf32> to vector<2xf32>
    %36 = vector.shape_cast %35 : vector<2xf32> to vector<2x1xf32>
    %cst_17 = arith.constant dense<0.000000e+00> : vector<2xf32>
    %37 = vector.multi_reduction <add>, %27, %cst_17 [1] : vector<2x8xf32> to vector<2xf32>
    %38 = vector.shape_cast %37 : vector<2xf32> to vector<2x1xf32>
    %cst_18 = arith.constant 9.99999974E-6 : f32
    %39 = vector.broadcast %cst_18 : f32 to vector<2x1xf32>
    %40 = arith.mulf %39, %38 : vector<2x1xf32>
    %41 = arith.addf %36, %40 : vector<2x1xf32>
    %42 = tpu.reciprocal %41 : vector<2x1xf32> -> vector<2x1xf32>
    %43 = vector.broadcast %42 : vector<2x1xf32> to vector<2x8xf32>
    %44 = arith.mulf %34, %43 : vector<2x8xf32>
    %45 = vector.shape_cast %44 : vector<2x8xf32> to vector<2x8x1xf32>
    %c0_19 = arith.constant 0 : index
    %c0_20 = arith.constant 0 : index
    %c0_21 = arith.constant 0 : index
    %46 = vector.load %arg2[%c0_19, %c0_20, %c0_21] : memref<2x8x32xf32, #tpu.memory_space<vmem>>, vector<2x8x32xf32>
    %47 = vector.broadcast %45 : vector<2x8x1xf32> to vector<2x8x32xf32>
    %48 = arith.mulf %47, %46 : vector<2x8x32xf32>
    %cst_22 = arith.constant dense<0.000000e+00> : vector<2x32xf32>
    %49 = vector.multi_reduction <add>, %48, %cst_22 [1] : vector<2x8x32xf32> to vector<2x32xf32>
    %c0_23 = arith.constant 0 : index
    %c0_24 = arith.constant 0 : index
    %50 = vector.load %arg8[%c0_23, %c0_24] : memref<2x32xf32, #tpu.memory_space<vmem>>, vector<2x32xf32>
    tpu.vector_store %arg8[%c0_23, %c0_24], %49 {strides = array<i32>} : memref<2x32xf32, #tpu.memory_space<vmem>>, vector<2x32xf32>,
    %cst_25 = arith.constant 0.000000e+00 : f32
    %51 = vector.broadcast %cst_25 : f32 to vector<2x120xf32>
    %52 = tpu.concatenate %44, %51 in 1 : vector<2x8xf32>, vector<2x120xf32> -> vector<2x128xf32>
    %c0_26 = arith.constant 0 : index
    %c0_27 = arith.constant 0 : index
    %53 = vector.load %arg9[%c0_26, %c0_27] : memref<2x128xf32, #tpu.memory_space<vmem>>, vector<2x128xf32>
    tpu.vector_store %arg9[%c0_26, %c0_27], %52 {strides = array<i32>} : memref<2x128xf32, #tpu.memory_space<vmem>>, vector<2x128xf32>,
    return
  }
  func.func @transform_0(%arg0: i32) -> (i32, i32, i32) {
    %c0_i32 = arith.constant 0 : i32
    %c0_i32_0 = arith.constant 0 : i32
    %c0_i32_1 = arith.constant 0 : i32
    return %arg0, %c0_i32, %c0_i32_0 : i32, i32, i32
  }
  func.func @transform_1(%arg0: i32) -> (i32, i32, i32) {
    %c0_i32 = arith.constant 0 : i32
    %c0_i32_0 = arith.constant 0 : i32
    %c0_i32_1 = arith.constant 0 : i32
    return %arg0, %c0_i32, %c0_i32_0 : i32, i32, i32
  }
  func.func @transform_2(%arg0: i32) -> (i32, i32) {
    %c0_i32 = arith.constant 0 : i32
    %c0_i32_0 = arith.constant 0 : i32
    return %arg0, %c0_i32 : i32, i32
  }
  func.func @transform_3(%arg0: i32) -> (i32, i32) {
    %c0_i32 = arith.constant 0 : i32
    %c0_i32_0 = arith.constant 0 : i32
    %c0_i32_1 = arith.constant 0 : i32
    return %c0_i32, %c0_i32_0 : i32, i32
  }
  func.func @transform_4(%arg0: i32) -> (i32, i32) {
    %c0_i32 = arith.constant 0 : i32
    %c0_i32_0 = arith.constant 0 : i32
    %c0_i32_1 = arith.constant 0 : i32
    return %c0_i32, %c0_i32_0 : i32, i32
  }
  func.func @transform_5(%arg0: i32) -> (i32, i32) {
    %c0_i32 = arith.constant 0 : i32
    %c0_i32_0 = arith.constant 0 : i32
    %c0_i32_1 = arith.constant 0 : i32
    return %c0_i32, %c0_i32_0 : i32, i32
  }
  func.func @transform_6(%arg0: i32) -> (i32, i32) {
    %c0_i32 = arith.constant 0 : i32
    %c0_i32_0 = arith.constant 0 : i32
    %c0_i32_1 = arith.constant 0 : i32
    return %c0_i32, %c0_i32_0 : i32, i32
  }
  func.func @transform_7(%arg0: i32) -> (i32, i32) {
    %c0_i32 = arith.constant 0 : i32
    %c0_i32_0 = arith.constant 0 : i32
    return %arg0, %c0_i32 : i32, i32
  }
  func.func @transform_8(%arg0: i32) -> (i32, i32) {
    %c0_i32 = arith.constant 0 : i32
    %c0_i32_0 = arith.constant 0 : i32
    return %arg0, %c0_i32 : i32, i32
  }
}

</mosaic_0001>

<bundles_post_ra>
// kernel: tpu_custom_call.1
= control target key start
LH: loop header
LB: loop body
LE: loop exit
PB: predicated region body
PF: predicated region fallthrough
CT: control target
= control target key end

     0   :  { %s747_s0 = inlined_call_operand.hbm [shape: f32[2,8,32], index: 0, kind: input, shape index: {}]   ;;  %s748_s1 = inlined_call_operand.hbm [shape: f32[2,8,32], index: 1, kind: input, shape index: {}]   ;;  %s749_s2 = inlined_call_operand.vmem [shape: s32[2,1], index: 2, kind: input, shape index: {}]   ;;  %s750_s3 = inlined_call_operand.hbm [shape: f32[32,32], index: 3, kind: input, shape index: {}]   ;;  %s751_s4 = inlined_call_operand.vmem [shape: f32[1,32], index: 4, kind: input, shape index: {}]   ;;  %s752_s5 = inlined_call_operand.vmem [shape: f32[1,32], index: 5, kind: input, shape index: {}]   ;;  %s753_s6 = inlined_call_operand.<no memory space> [shape: f32[1,1], index: 6, kind: input, shape index: {}]   ;;  %s754_s7 = inlined_call_operand.hbm [shape: f32[2,32], index: 7, kind: output, shape index: {0}]   ;;  %s755_s8 = inlined_call_operand.hbm [shape: f32[2,128], index: 8, kind: output, shape index: {1}]  }
   0x1   :  { %v14_v0 = vstv %s753_s6 }
   0x2   :  { %15 = vst [vmem:[#allocation2] sm:$0x1] %v14_v0 }
   0x3   :  { %16 = vsyncpa [#allocation4], 0 }
   0x4   :  { %17 = vsyncpa [#allocation7], 0 }
   0x5   :  { %18 = vsyncpa [#allocation5], 0 }
   0x6   :  { %19 = vsyncpa [#allocation11], 0  ;;  %s579_s29 = smov [#allocation6]   ;;  %s580_s9 = smov [#allocation3]  }
   0x7   :  { %s37_s30 = sshll.u32 %s579_s29, 4  ;;  %s25_s10 = sshll.u32 %s580_s9, 4  ;;  %s38_s30 = int_to_ptr.vmem [resolvable:$true] %s37_s30  ;;  %s636_s10 = int_to_ptr.vmem [resolvable:$true] %s25_s10 }
   0x8   :  { %s461_s13 = scalar_lea.hbm %s748_s1, 256 }
   0x9   :  { %p462_p0 = scmp.ne.s32.totalorder %s748_s1, %s461_s13  ;;  %p465_p1 = scmp.lt.u32.totalorder %s461_s13, %s748_s1 }
   0xb   :  { %p467_p2 = pnand %p465_p1, %p462_p0 }
   0xd   :  { %470 = shalt.err (!%p467_p2)
}
   0xe   :  { %s471_s17 = scalar_lea.vmem %s38_s30, 256  ;;  %p476_p4 = scmp.lt.s32.totalorder %s38_s30, %s38_s30 }
   0xf   :  { %p472_p3 = scmp.ne.s32.totalorder %s38_s30, %s471_s17  ;;  %p477_p5 = scmp.lt.s32.totalorder %s471_s17, %s471_s17 }
  0x11   :  { %p478_p6 = por %p477_p5, %p476_p4 }
  0x13   :  { %p479_p7 = pnand %p478_p6, %p472_p3 }
  0x15   :  { %482 = shalt.err (!%p479_p7)
}
  0x16   :  { %s581_s18 = smov 128   ;;  %s582_s19 = smov 8  }
  0x17   :  { %43 = dma.hbm_to_vmem [thread:$0]  %s748_s1, 256, %s38_s30, [#allocation7], %s581_s18, %s581_s18, %s582_s19  }
  0x18   :  { %s483_s24 = scalar_lea.hbm %s747_s0, 256 }
  0x19   :  { %p484_p8 = scmp.ne.s32.totalorder %s747_s0, %s483_s24  ;;  %p487_p9 = scmp.lt.u32.totalorder %s483_s24, %s747_s0 }
  0x1b   :  { %p489_p10 = pnand %p487_p9, %p484_p8 }
  0x1d   :  { %492 = shalt.err (!%p489_p10)
}
  0x1e   :  { %s493_s29 = scalar_lea.vmem %s636_s10, 256  ;;  %p498_p12 = scmp.lt.s32.totalorder %s636_s10, %s636_s10 }
  0x1f   :  { %p494_p11 = scmp.ne.s32.totalorder %s636_s10, %s493_s29  ;;  %p499_p13 = scmp.lt.s32.totalorder %s493_s29, %s493_s29 }
  0x21   :  { %p500_p0 = por %p499_p13, %p498_p12 }
  0x23   :  { %p501_p1 = pnand %p500_p0, %p494_p11 }
  0x25   :  { %504 = shalt.err (!%p501_p1)
}
  0x26   :  { %31 = dma.hbm_to_vmem [thread:$0]  %s747_s0, 256, %s636_s10, [#allocation4], %s581_s18, %s581_s18, %s582_s19  }
  0x27   :  { %s583_s9 = smov [#allocation8]   ;;  %s505_s14 = scalar_lea.hbm %s750_s3, 512 }
  0x28   :  { %s51_s11 = sshll.u32 %s583_s9, 4  ;;  %p506_p2 = scmp.ne.s32.totalorder %s750_s3, %s505_s14  ;;  %s52_s11 = int_to_ptr.vmem [resolvable:$true] %s51_s11 }
  0x29   :  { %p509_p3 = scmp.lt.u32.totalorder %s505_s14, %s750_s3 }
  0x2b   :  { %p511_p4 = pnand %p509_p3, %p506_p2 }
  0x2d   :  { %514 = shalt.err (!%p511_p4)
}
  0x2e   :  { %s515_s20 = scalar_lea.vmem %s52_s11, 512  ;;  %p520_p6 = scmp.lt.s32.totalorder %s52_s11, %s52_s11 }
  0x2f   :  { %p516_p5 = scmp.ne.s32.totalorder %s52_s11, %s515_s20  ;;  %p521_p7 = scmp.lt.s32.totalorder %s515_s20, %s515_s20 }
  0x31   :  { %p522_p8 = por %p521_p7, %p520_p6 }
  0x33   :  { %p523_p9 = pnand %p522_p8, %p516_p5 }
  0x35   :  { %526 = shalt.err (!%p523_p9)
}
  0x36   :  { %57 = dma.hbm_to_vmem [thread:$0]  %s750_s3, 512, %s52_s11, [#allocation7], %s581_s18, %s581_s18, %s582_s19  }
  0x37   :  { %571 = dma.done.wait [#allocation4], 256  }
  0x38   :  { %572 = vsyncadd [#allocation4], 4294967040 }
  0x39   :  { %573 = dma.done.wait [#allocation7], 768  }
  0x3a   :  { %574 = vsyncadd [#allocation7], 4294966528  ;;  %vm86_vm0 = vcmask 261120   ;;  %v75_v1 = vld [vmem:[#allocation8] sm:$0xff]  ;;  %v76_v2 = vld [vmem:[#allocation8 + $0x8] sm:$0xff]  ;;  %v584_v23 = vmov 0   ;;  %v214_v38 = vlaneseq }
  0x3b   :  { %v77_v3 = vld [vmem:[#allocation8 + $0x10] sm:$0xff]  ;;  %v432_v4 = vpack.c.bf16 %v76_v2, %v75_v1  ;;  %v78_v5 = vld [vmem:[#allocation8 + $0x18] sm:$0xff]  ;;  %v73_v6 = vld [vmem:[#allocation3] sm:$0xff]  ;;  %449 = vset.pattern.permute.xlu0 %v584_v23  ;;  %450 = vset.pattern.permute.xlu1 %v584_v23  ;;  %vm224_vm1 = vcmask 1041409   ;;  %vm227_vm2 = vcmask 58368   ;;  %v585_v50 = vmov 0.0  }
  0x3c   :  { %v436_v7 = vpack.c.bf16 %v78_v5, %v77_v3  ;;  %429 = vmatprep.mubr.msk.f32.mxu0 %vm86_vm0, %v73_v6  ;;  %v74_v8 = vld [vmem:[#allocation3 + $0x8] sm:$0xff]  ;;  %v409_v9 = vld [vmem:[%s751_s4] ss:$0 sm:$0xff]  ;;  %v215_v39 = vand.u32 127, %v214_v38  ;;  %v217_v40 = vshrl.u32 %v214_v38, 7  ;;  %vm376_vm4 = vcmask 64512  }
  0x3d   :  { %433 = vmatprep.subr.bf16.mxu0 %v432_v4  ;;  %v412_v12 = vld [vmem:[%s752_s5] ss:$0 sm:$0xff] }
  0x3e   :  { %435 = vmatpush3.bf16.msra.mxu0 %v432_v4  ;;  %v413_v30 = vld [vmem:[#allocation2] ss:$0 sm:$0xff]  ;;  %v703_v41 = vsub.s32 %v215_v39, %v217_v40  ;;  %v234_v47 = vsub.s32 0, %v217_v40  ;;  %v238_v53 = vsub.s32 1, %v217_v40 }
  0x3f   :  { %437 = vmatprep.subr.bf16.mxu0 %v436_v7  ;;  %v248_v37 = vld [vmem:[%s749_s2] sm:$0x3]  ;;  %s586_s2 = smov [#allocation10]  }
  0x40   :  { %s395_s22 = sshll.u32 %s586_s2, 4  ;;  %s396_s22 = int_to_ptr.vmem [resolvable:$true] %s395_s22 }
  0x41   :  { %s527_s23 = scalar_lea.vmem %s396_s22, 32  ;;  %p532_p11 = scmp.lt.s32.totalorder %s396_s22, %s396_s22 }
  0x42   :  { %439 = vmatpush3.bf16.msra.mxu0 %v436_v7  ;;  %p528_p10 = scmp.ne.s32.totalorder %s396_s22, %s527_s23  ;;  %p533_p12 = scmp.lt.s32.totalorder %s527_s23, %s527_s23 }
  0x44   :  { %p534_p13 = por %p533_p12, %p532_p11 }
  0x45   :  { %430 = vmatmul.mubr.msk.f32.vlgmr.msra.gmra.mrb[0].mxu0 %vm86_vm0, %v74_v8 }
  0x46   :  { %p535_p0 = pnand %p534_p13, %p528_p10 }
 0x118   :  { %v431_v10 = vpop.f32.mrb[0].mxu0 }
 0x119   :  { %v159_v11 = vpop.f32.mrb[1].mxu0  ;;  %v165_v13 = vadd.f32 %v431_v10, %v409_v9 }
 0x11a   :  { %v160_v14 = vadd.f32 %v409_v9, %v159_v11 }
 0x11b   :  { %v184_v19 = vmul.f32 %v412_v12, %v165_v13  ;;  %v170_v20 = vmul.f32 %v165_v13, %v165_v13 }
 0x11c   :  { %v183_v15 = vmul.f32 %v412_v12, %v160_v14  ;;  %v169_v16 = vmul.f32 %v160_v14, %v160_v14 }
 0x11d   :  { %v188_v21 = vsel %vm86_vm0, %v184_v19, 0.0  ;;  %v174_v22 = vsel %vm86_vm0, %v170_v20, 0.0 }
 0x11e   :  { %v185_v17 = vsel %vm86_vm0, %v183_v15, 0.0  ;;  %v171_v18 = vsel %vm86_vm0, %v169_v16, 0.0 }
 0x11f   :  { %186 = vadd.xlane.f32.xlu1 %v185_v17  ;;  %172 = vadd.xlane.f32.xlu0 %v171_v18 }
 0x123   :  { %189 = vadd.xlane.f32.xlu1 %v188_v21  ;;  %175 = vadd.xlane.f32.xlu0 %v174_v22 }
 0x1ac   :  { %v173_v24 = vpop.xlane.xlu0 %172  ;;  %v187_v28 = vpop.xlane.xlu1 %186 }
 0x1ad   :  { %v191_v25 = vmax.f32 %v173_v24, 1e-24 }
 0x1af   :  { %451 = vrsqrt.f32 %v191_v25  ;;  %v333_v25 = vld [vmem:[#allocation6 + $0x8] sm:$0xff] }
 0x1b0   :  { %v176_v26 = vpop.xlane.xlu0 %175  ;;  %v190_v34 = vpop.xlane.xlu1 %189 }
 0x1b1   :  { %v192_v27 = vmax.f32 %v176_v26, 1e-24  ;;  %v332_v26 = vld [vmem:[#allocation6] sm:$0xff] }
 0x1b3   :  { %453 = vrsqrt.f32 %v192_v27 }
 0x1b9   :  { %v452_v29 = vpop.eup %451 }
 0x1ba   :  { %v195_v31 = vmul.f32 %v452_v29, %v187_v28 }
 0x1bc   :  { %v204_v32 = vadd.f32 %v413_v30, %v195_v31 }
 0x1bd   :  { %v454_v33 = vpop.eup %453 }
 0x1be   :  { %209 = vperm.xlu0 %449, %v204_v32   ;;  %v196_v35 = vmul.f32 %v454_v33, %v190_v34 }
 0x1c0   :  { %v205_v36 = vadd.f32 %v413_v30, %v196_v35 }
 0x1c2   :  { %212 = vperm.xlu1 %450, %v205_v36  }
 0x1c6   :  { %250 = vperm.xlu1 %450, %v248_v37  }
 0x23d   :  { %v210_v42 = vpop.permute.xlu0 %209 }
 0x23e   :  { %v219_v44 = vrot.slane %v210_v42, %v703_v41 }
 0x241   :  { %v213_v43 = vpop.permute.xlu1 %212 }
 0x242   :  { %v223_v45 = vrot.slane %v213_v43, %v703_v41 }
 0x244   :  { %v225_v46 = vsel %vm224_vm1, %v223_v45, %v219_v44 }
 0x245   :  { %v251_v48 = vpop.permute.xlu1 %250  ;;  %v228_v49 = vsel %vm227_vm2, %v225_v46, -inf }
 0x246   :  { %vm252_vm3 = vcmp.lt.s32.totalorder %v215_v39, %v251_v48  ;;  %229 = vmax.xlane.f32.xlu1 %v228_v49 }
 0x247   :  { %v414_v51 = vsel %vm252_vm3, 1.0, %v585_v50 }
 0x248   :  { %v259_v52 = vrot.slane %v414_v51, %v234_v47  ;;  %v266_v54 = vrot.slane %v414_v51, %v238_v53 }
 0x24a   :  { %261 = vbcast.lane.b32.xlu0 %v259_v52, 256 }
 0x24e   :  { %268 = vbcast.lane.b32.xlu0 %v266_v54, 256 }
 0x2bc   :  { %v262_v63 = vpop.permute.xlu0 %261 }
 0x2c0   :  { %v269_v2 = vpop.permute.xlu0 %268 }
 0x2d3   :  { %v230_v55 = vpop.xlane.xlu1 %229 }
 0x2d4   :  { %v235_v56 = vrot.slane %v230_v55, %v234_v47  ;;  %v239_v57 = vrot.slane %v230_v55, %v238_v53 }
 0x2d6   :  { %v242_v58 = vsub.f32 %v204_v32, %v235_v56  ;;  %v243_v59 = vsub.f32 %v205_v36, %v239_v57 }
 0x2d8   :  { %v244_v60 = vmul.f32 1.442695, %v242_v58  ;;  %v246_v61 = vmul.f32 1.442695, %v243_v59 }
 0x2da   :  { %455 = vpow2.f32 %v244_v60 }
 0x2db   :  { %457 = vpow2.f32 %v246_v61 }
 0x2e4   :  { %v456_v62 = vpop.eup %455 }
 0x2e5   :  { %298 = vperm.xlu0 %449, %v456_v62   ;;  %v272_v0 = vmul.f32 %v456_v62, %v262_v63  ;;  %v458_v1 = vpop.eup %457 }
 0x2e6   :  { %v273_v3 = vmul.f32 %v458_v1, %v269_v2 }
 0x2e7   :  { %277 = vperm.xlu1 %450, %v272_v0  }
 0x2e9   :  { %301 = vperm.xlu0 %449, %v458_v1  }
 0x2ed   :  { %280 = vperm.xlu0 %449, %v273_v3  }
 0x364   :  { %v299_v4 = vpop.permute.xlu0 %298 }
 0x365   :  { %v306_v6 = vrot.slane %v299_v4, %v703_v41 }
 0x366   :  { %v278_v8 = vpop.permute.xlu1 %277 }
 0x367   :  { %v285_v12 = vrot.slane %v278_v8, %v703_v41 }
 0x368   :  { %v302_v5 = vpop.permute.xlu0 %301 }
 0x369   :  { %v310_v7 = vrot.slane %v302_v5, %v703_v41 }
 0x36b   :  { %v311_v9 = vsel %vm224_vm1, %v310_v7, %v306_v6 }
 0x36c   :  { %v281_v10 = vpop.permute.xlu0 %280  ;;  %v313_v11 = vsel %vm227_vm2, %v311_v9, 0.0 }
 0x36d   :  { %v289_v13 = vrot.slane %v281_v10, %v703_v41  ;;  %314 = vadd.xlane.f32.xlu0 %v313_v11 }
 0x36f   :  { %v290_v14 = vsel %vm224_vm1, %v289_v13, %v285_v12 }
 0x370   :  { %v292_v15 = vsel %vm227_vm2, %v290_v14, 0.0 }
 0x371   :  { %293 = vadd.xlane.f32.xlu1 %v292_v15 }
 0x3fa   :  { %v315_v16 = vpop.xlane.xlu0 %314 }
 0x3fb   :  { %v316_v17 = vmul.f32 1e-05, %v315_v16 }
 0x3fe   :  { %v294_v18 = vpop.xlane.xlu1 %293 }
 0x3ff   :  { %v317_v19 = vadd.f32 %v316_v17, %v294_v18 }
 0x401   :  { %459 = vrcp.f32 %v317_v19 }
 0x40b   :  { %v460_v20 = vpop.eup %459 }
 0x40c   :  { %v327_v21 = vrot.slane %v460_v20, %v238_v53  ;;  %v323_v22 = vrot.slane %v460_v20, %v234_v47 }
 0x40e   :  { %v331_v23 = vmul.f32 %v327_v21, %v273_v3  ;;  %v330_v24 = vmul.f32 %v323_v22, %v272_v0 }
 0x410   :  { %341 = vperm.xlu1 %450, %v331_v23   ;;  %336 = vperm.xlu0 %449, %v330_v24  }
 0x48f   :  { %v342_v27 = vpop.permute.xlu1 %341  ;;  %v337_v28 = vpop.permute.xlu0 %336 }
 0x490   :  { %v345_v29 = vmul.f32 %v342_v27, %v333_v25  ;;  %v373_v30 = vrot.slane %v342_v27, %v703_v41  ;;  %v344_v31 = vmul.f32 %v337_v28, %v332_v26  ;;  %v369_v32 = vrot.slane %v337_v28, %v703_v41 }
 0x492   :  { %v353_v33 = vsel %vm86_vm0, %v345_v29, 0.0  ;;  %v346_v34 = vsel %vm86_vm0, %v344_v31, 0.0  ;;  %v374_v35 = vsel %vm224_vm1, %v373_v30, %v369_v32 }
 0x493   :  { %v354_v36 = vrot.slane %v353_v33, 4  ;;  %v347_v37 = vrot.slane %v346_v34, 4  ;;  %v377_v38 = vsel %vm376_vm4, %v374_v35, 0.0 }
 0x494   :  { %378 = vst [vmem:[#allocation10] sm:$0x3] %v377_v38 }
 0x495   :  { %v355_v39 = vadd.f32 %v354_v36, %v353_v33  ;;  %v348_v40 = vadd.f32 %v347_v37, %v346_v34 }
 0x496   :  { %538 = shalt.err (!%p535_p0)
}
 0x497   :  { %s539_s26 = scalar_lea.hbm %s755_s8, 32 }
 0x498   :  { %p540_p1 = scmp.ne.s32.totalorder %s755_s8, %s539_s26  ;;  %p543_p2 = scmp.lt.u32.totalorder %s539_s26, %s755_s8 }
 0x49a   :  { %p545_p3 = pnand %p543_p2, %p540_p1 }
 0x49c   :  { %548 = shalt.err (!%p545_p3)
}
 0x49d   :  { %398 = dma.vmem_to_hbm [thread:$0]  %s396_s22, 32, %s755_s8, [#allocation11]   ;;  %v356_v41 = vrot.slane %v355_v39, 2  ;;  %v349_v42 = vrot.slane %v348_v40, 2  ;;  %vm364_vm5 = vcmask 254976  }
 0x49e   :  { %s587_s11 = smov [#allocation9]  }
 0x49f   :  { %v357_v43 = vadd.f32 %v356_v41, %v355_v39  ;;  %v350_v44 = vadd.f32 %v349_v42, %v348_v40  ;;  %s385_s12 = sshll.u32 %s587_s11, 4  ;;  %s386_s12 = int_to_ptr.vmem [resolvable:$true] %s385_s12 }
 0x4a0   :  { %s549_s13 = scalar_lea.vmem %s386_s12, 32  ;;  %p554_p5 = scmp.lt.s32.totalorder %s386_s12, %s386_s12 }
 0x4a1   :  { %v358_v45 = vrot.slane %v357_v43, 1  ;;  %v351_v46 = vrot.slane %v350_v44, 1  ;;  %p550_p4 = scmp.ne.s32.totalorder %s386_s12, %s549_s13  ;;  %p555_p6 = scmp.lt.s32.totalorder %s549_s13, %s549_s13 }
 0x4a3   :  { %v359_v47 = vadd.f32 %v358_v45, %v357_v43  ;;  %v352_v48 = vadd.f32 %v351_v46, %v350_v44  ;;  %p556_p7 = por %p555_p6, %p554_p5 }
 0x4a5   :  { %v362_v49 = vsel %vm224_vm1, %v359_v47, %v352_v48  ;;  %p557_p8 = pnand %p556_p7, %p550_p4 }
 0x4a6   :  { %365 = vst.msk [vmem:[#allocation9] sm:$0x3] %vm364_vm5, %v362_v49 }
 0x4a7   :  { %560 = shalt.err (!%p557_p8)
}
 0x4a8   :  { %s561_s15 = scalar_lea.hbm %s754_s7, 32 }
 0x4a9   :  { %p562_p9 = scmp.ne.s32.totalorder %s754_s7, %s561_s15  ;;  %p565_p10 = scmp.lt.u32.totalorder %s561_s15, %s754_s7 }
 0x4ab   :  { %p567_p11 = pnand %p565_p10, %p562_p9 }
 0x4ad   :  { %570 = shalt.err (!%p567_p11)
}
 0x4ae   :  { %388 = dma.vmem_to_hbm [thread:$0]  %s386_s12, 32, %s754_s7, [#allocation5]  }
 0x4af   :  { %575 = dma.done.wait [#allocation5], 32  }
 0x4b0   :  { %576 = vsyncadd [#allocation5], 4294967264 }
 0x4b1   :  { %577 = dma.done.wait [#allocation11], 32  }
 0x4b2   :  { %578 = vsyncadd [#allocation11], 4294967264 }
 0x4b3   :  { %405 = vsyncpa [#allocation4], 1 }
 0x4b4   :  { %406 = vsyncpa [#allocation7], 1 }
 0x4b5   :  { %407 = vsyncpa [#allocation5], 1 }
 0x4b6   :  { %408 = vsyncpa [#allocation11], 1 }

</bundles_post_ra>
